<compile_context>
chip_gen: v6e
topology: v6e:2x2x1
jax: 0.10.0
libtpu: 0.0.40
codegen_flags: <defaults>
</compile_context>

<pallas_src>
import jax
import jax.numpy as jnp
from jax.experimental import pallas as pl
from jax.experimental.pallas import tpu as pltpu

_TARGET_BLOCK_BYTES = 4 * 1024 * 1024   # 4 MiB per block buffer
_VMEM_LIMIT_BYTES = 32 * 1024 * 1024    # safe on v5e/v6e/v7x


def _compress_normal_kernel(x_ref, o_ref):
    x = x_ref[...]
    # de-normalize to pixel range
    lr_pix = (x + 1.0) * 127.5
    # uint8 save/reload round-trip: round (half-to-even, same as torch.round)
    # and clip; clip is a no-op for inputs in [-1, 1] but keeps the emulated
    # uint8 cast well-defined otherwise.
    q = jnp.clip(jnp.round(lr_pix), 0.0, 255.0)
    # ToTensor() (/255) and the final *2-1 folded into one multiply-add
    o_ref[...] = q * (2.0 / 255.0) - 1.0


def _run_quant_2d(x2d, *, donate=False):
    """Tiled elementwise quantize round-trip over a 2-D view (rows, lanes)."""
    rows, lanes = x2d.shape

    # Row cap targeting ~4 MiB f32 blocks (multiple of 8 sublanes).
    cap = max(8, (_TARGET_BLOCK_BYTES // (4 * lanes)) // 8 * 8)
    tile_rows = min(cap, rows)
    if tile_rows < rows:
        # partial tiles must be (8, 128)-aligned; full-array tiles need not be
        tile_rows = max(8, (tile_rows // 8) * 8)
    if rows >= 16 and pl.cdiv(rows, tile_rows) < 2:
        # >= 2 grid steps so both v7x TensorCores get work (free elsewhere)
        tile_rows = max(8, ((rows // 2 + 7) // 8) * 8)
    grid = (pl.cdiv(rows, tile_rows),)

    extra = {}
    if donate:
        # Only sensible when the caller truly donates the buffer (otherwise
        # XLA inserts a defensive copy and the alias buys nothing).
        extra["input_output_aliases"] = {0: 0}

    return pl.pallas_call(
        _compress_normal_kernel,
        out_shape=jax.ShapeDtypeStruct(x2d.shape, x2d.dtype),
        grid=grid,
        in_specs=[pl.BlockSpec((tile_rows, lanes), lambda i: (i, 0))],
        out_specs=pl.BlockSpec((tile_rows, lanes), lambda i: (i, 0)),
        compiler_params=pltpu.CompilerParams(
            dimension_semantics=("parallel",),
            vmem_limit_bytes=_VMEM_LIMIT_BYTES,
        ),
        **extra,
    )(x2d)


def compress_normal_forward(lr, donate=False):
    """lr: float32 NCHW array in [-1, 1]. Returns (recon, bits).

    recon has a leading unsqueeze(0) like the PyTorch module:
      (1, N, C, H, W), values in [-1, 1].
    bits is the raw uint8 payload size in bytes (placeholder for the codec
    bitstream length, see TODO above).
    """
    n, c, h, w = lr.shape
    total = n * c * h * w

    # Lane-dense flattening without any pad/slice: pick the widest lane count
    # in {1024, 512, 256, 128} that divides the element count exactly (prefer
    # one that also yields >= 8 rows).  The reshape is a free bit-cast.
    divisors = [d for d in (1024, 512, 256, 128) if total % d == 0]
    if divisors:
        lanes = next((d for d in divisors if total // d >= 8), divisors[0])
        x2d = lr.reshape(total // lanes, lanes)
    else:
        # Fallback (element count not a multiple of 128): tile the original
        # layout as (N*C*H, W).  Still zero extra HBM passes; stores may be
        # lane-masked when W is not a multiple of 128.
        x2d = lr.reshape(n * c * h, w)

    out2d = _run_quant_2d(x2d, donate=donate)

    recon = out2d.reshape(n, c, h, w)[None]   # unsqueeze(0); free reshape
    # TODO(synk): real bits come from the GMM entropy model; placeholder is
    # the raw uint8 payload size (C*H*W bytes).
    bits = jnp.float32(c * h * w)
    return recon, bits


if __name__ == "__main__":
    key = jax.random.PRNGKey(0)
    # small image-like input: batch=2, channels=4, spatial=16x16, in [-1, 1]
    x = jax.random.uniform(key, (2, 4, 16, 16), dtype=jnp.float32,
                           minval=-1.0, maxval=1.0)

    recon, bits = compress_normal_forward(x)
    recon = jax.block_until_ready(recon)
    bits = jax.block_until_ready(bits)

    # sanity check against a pure-JAX reference of the same quantize round-trip
    ref = jnp.clip(jnp.round((x + 1.0) * 127.5), 0.0, 255.0) * (2.0 / 255.0) - 1.0
    assert recon.shape == (1, 2, 4, 16, 16)
    assert jnp.allclose(recon[0], ref, atol=1e-6)

    print("KERNEL_OK")
</pallas_src>

<mosaic_0001>
module attributes {stable_mosaic.version = 11 : i64} {
  func.func @_compress_normal_kernel(%arg0: i32, %arg1: memref<8x256xf32, #tpu.memory_space<vmem>>, %arg2: memref<8x256xf32, #tpu.memory_space<vmem>>) attributes {dimension_semantics = [#tpu.dimension_semantics<parallel>], iteration_bounds = array<i64: 1>, scalar_prefetch = 0 : i64, scratch_operands = 0 : i64, tpu.core_type = #tpu.core_type<tc>, window_params = [{transform_indices = @transform_0, window_bounds = array<i64: 8, 256>}, {transform_indices = @transform_1, window_bounds = array<i64: 8, 256>}]} {
    %c0 = arith.constant 0 : index
    %c0_0 = arith.constant 0 : index
    %0 = vector.load %arg1[%c0, %c0_0] : memref<8x256xf32, #tpu.memory_space<vmem>>, vector<8x256xf32>
    %cst = arith.constant 1.000000e+00 : f32
    %1 = vector.broadcast %cst : f32 to vector<8x256xf32>
    %2 = arith.addf %0, %1 : vector<8x256xf32>
    %cst_1 = arith.constant 1.275000e+02 : f32
    %3 = vector.broadcast %cst_1 : f32 to vector<8x256xf32>
    %4 = arith.mulf %2, %3 : vector<8x256xf32>
    %5 = math.roundeven %4 : vector<8x256xf32>
    %cst_2 = arith.constant 0.000000e+00 : f32
    %cst_3 = arith.constant 2.550000e+02 : f32
    %6 = vector.broadcast %cst_2 : f32 to vector<8x256xf32>
    %7 = arith.maximumf %6, %5 : vector<8x256xf32>
    %8 = vector.broadcast %cst_3 : f32 to vector<8x256xf32>
    %9 = arith.minimumf %8, %7 : vector<8x256xf32>
    %cst_4 = arith.constant 0.00784313772 : f32
    %10 = vector.broadcast %cst_4 : f32 to vector<8x256xf32>
    %11 = arith.mulf %9, %10 : vector<8x256xf32>
    %cst_5 = arith.constant 1.000000e+00 : f32
    %12 = vector.broadcast %cst_5 : f32 to vector<8x256xf32>
    %13 = arith.subf %11, %12 : vector<8x256xf32>
    %c0_6 = arith.constant 0 : index
    %c0_7 = arith.constant 0 : index
    %14 = vector.load %arg2[%c0_6, %c0_7] : memref<8x256xf32, #tpu.memory_space<vmem>>, vector<8x256xf32>
    tpu.vector_store %arg2[%c0_6, %c0_7], %13 {strides = array<i32>} : memref<8x256xf32, #tpu.memory_space<vmem>>, vector<8x256xf32>,
    return
  }
  func.func @transform_0(%arg0: i32) -> (i32, i32) {
    %c0_i32 = arith.constant 0 : i32
    %c0_i32_0 = arith.constant 0 : i32
    return %arg0, %c0_i32 : i32, i32
  }
  func.func @transform_1(%arg0: i32) -> (i32, i32) {
    %c0_i32 = arith.constant 0 : i32
    %c0_i32_0 = arith.constant 0 : i32
    return %arg0, %c0_i32 : i32, i32
  }
}

</mosaic_0001>

<bundles_post_ra>
// kernel: tpu_custom_call.1
= control target key start
LH: loop header
LB: loop body
LE: loop exit
PB: predicated region body
PF: predicated region fallthrough
CT: control target
= control target key end

     0   :  { %6 = vsyncpa [#allocation3], 0  ;;  %s136_s0 = inlined_call_operand.hbm [shape: f32[8,256], index: 0, kind: input, shape index: {}]   ;;  %s137_s1 = inlined_call_operand.hbm [shape: f32[8,256], index: 1, kind: output, shape index: {}]  }
   0x1   :  { %7 = vsyncpa [#allocation4], 0  ;;  %s118_s6 = smov [#allocation2]  }
   0x2   :  { %s14_s7 = sshll.u32 %s118_s6, 4  ;;  %s15_s7 = int_to_ptr.vmem [resolvable:$true] %s14_s7 }
   0x3   :  { %s82_s8 = scalar_lea.vmem %s15_s7, 256  ;;  %p87_p1 = scmp.lt.s32.totalorder %s15_s7, %s15_s7 }
   0x4   :  { %p83_p0 = scmp.ne.s32.totalorder %s15_s7, %s82_s8  ;;  %p88_p2 = scmp.lt.s32.totalorder %s82_s8, %s82_s8 }
   0x6   :  { %p89_p3 = por %p88_p2, %p87_p1 }
   0x8   :  { %p90_p4 = pnand %p89_p3, %p83_p0 }
   0xa   :  { %93 = shalt.err (!%p90_p4)
}
   0xb   :  { %17 = dma.hbm_to_vmem [thread:$0]  %s136_s0, 256, %s15_s7, [#allocation3]  }
   0xc   :  { %114 = dma.done.wait [#allocation3], 256  }
   0xd   :  { %115 = vsyncadd [#allocation3], 4294967040  ;;  %v21_v0 = vld [vmem:[#allocation2] sm:$0xff]  ;;  %v22_v1 = vld [vmem:[#allocation2 + $0x8] sm:$0xff]  ;;  %s119_s0 = smov [#allocation5]  }
   0xe   :  { %v23_v2 = vadd.f32 1.0, %v21_v0  ;;  %v24_v3 = vadd.f32 1.0, %v22_v1  ;;  %s45_s11 = sshll.u32 %s119_s0, 4  ;;  %s46_s11 = int_to_ptr.vmem [resolvable:$true] %s45_s11 }
   0xf   :  { %s94_s12 = scalar_lea.vmem %s46_s11, 256  ;;  %p99_p6 = scmp.lt.s32.totalorder %s46_s11, %s46_s11 }
  0x10   :  { %v25_v4 = vmul.f32 127.5, %v23_v2  ;;  %v26_v5 = vmul.f32 127.5, %v24_v3  ;;  %p95_p5 = scmp.ne.s32.totalorder %s46_s11, %s94_s12  ;;  %p100_p7 = scmp.lt.s32.totalorder %s94_s12, %s94_s12 }
  0x12   :  { %v58_v6 = vcvt.f32.s32 %v25_v4  ;;  %v56_v7 = vand.u32 2147483647, %v25_v4  ;;  %v66_v8 = vcvt.f32.s32 %v26_v5  ;;  %v61_v10 = vand.u32 2147483648, %v25_v4  ;;  %p101_p8 = por %p100_p7, %p99_p6 }
  0x13   :  { %v64_v11 = vand.u32 2147483647, %v26_v5  ;;  %v69_v13 = vand.u32 2147483648, %v26_v5 }
  0x14   :  { %v59_v9 = vcvt.s32.f32 %v58_v6  ;;  %v67_v12 = vcvt.s32.f32 %v66_v8  ;;  %vm57_vm0 = vcmp.lt.f32.partialorder %v56_v7, 8388608.0  ;;  %p102_p9 = pnand %p101_p8, %p95_p5 }
  0x15   :  { %vm65_vm1 = vcmp.lt.f32.partialorder %v64_v11, 8388608.0 }
  0x16   :  { %v60_v14 = vand.u32 2147483647, %v59_v9  ;;  %v68_v15 = vand.u32 2147483647, %v67_v12 }
  0x18   :  { %v62_v16 = vor.u32 %v61_v10, %v60_v14  ;;  %v70_v17 = vor.u32 %v69_v13, %v68_v15 }
  0x1a   :  { %v63_v18 = vsel %vm57_vm0, %v62_v16, %v25_v4  ;;  %v71_v20 = vsel %vm65_vm1, %v70_v17, %v26_v5 }
  0x1b   :  { %v29_v19 = vmax.f32 %v63_v18, 0.0  ;;  %v30_v21 = vmax.f32 %v71_v20, 0.0 }
  0x1d   :  { %v31_v22 = vmin.f32 %v29_v19, 255.0  ;;  %v32_v23 = vmin.f32 %v30_v21, 255.0 }
  0x1f   :  { %v33_v24 = vmul.f32 0.007843138, %v31_v22  ;;  %v34_v25 = vmul.f32 0.007843138, %v32_v23 }
  0x21   :  { %v54_v26 = vadd.f32 -1.0, %v33_v24  ;;  %v55_v27 = vadd.f32 -1.0, %v34_v25 }
  0x23   :  { %37 = vst [vmem:[#allocation5] sm:$0xff] %v54_v26  ;;  %38 = vst [vmem:[#allocation5 + $0x8] sm:$0xff] %v55_v27 }
  0x24   :  { %105 = shalt.err (!%p102_p9)
}
  0x25   :  { %48 = dma.vmem_to_hbm [thread:$0]  %s46_s11, 256, %s137_s1, [#allocation4]  }
  0x26   :  { %116 = dma.done.wait [#allocation4], 256  }
  0x27   :  { %117 = vsyncadd [#allocation4], 4294967040 }
  0x28   :  { %52 = vsyncpa [#allocation3], 1 }
  0x29   :  { %53 = vsyncpa [#allocation4], 1 }

</bundles_post_ra>
